<compile_context>
chip_gen: v6e
topology: v6e:2x2x1
jax: 0.10.0
libtpu: 0.0.40
codegen_flags: <defaults>
</compile_context>

<pallas_src>
import jax
import jax.numpy as jnp
import numpy as np
from jax.experimental import pallas as pl
from jax.experimental.pallas import tpu as pltpu


def _attn_dropout_kernel(scale_ref, q_ref, k_ref, mask_ref, v_ref, o_ref):
    # scale lives in SMEM; q/k/mask/v/o live in VMEM (whole arrays, no grid).

    # v1 = x1 @ x2^T  -- contract last dims of both operands so the MXU
    # consumes K in its native orientation (no explicit transpose).
    s = jax.lax.dot_general(
        q_ref[...], k_ref[...],
        dimension_numbers=(((1,), (1,)), ((), ())),
        preferred_element_type=jnp.float32,
    )

    # v2 = v1 * scale
    s = s * scale_ref[0]

    # v3 = softmax(v2, axis=-1): reciprocal on the (S,1) column, then a
    # broadcast multiply (cheaper than a full (S,S) divide).
    m = jnp.max(s, axis=-1, keepdims=True)
    e = jnp.exp(s - m)
    inv_denom = 1.0 / jnp.sum(e, axis=-1, keepdims=True)
    probs = e * inv_denom

    # v4 = dropout(v3, p): mask is precomputed as {0, 1/(1-p)} -> one multiply.
    dropped = probs * mask_ref[...]

    # v5 = v4 @ x3
    o_ref[...] = jnp.dot(dropped, v_ref[...], preferred_element_type=jnp.float32)


def attention_dropout(x1, x2, x3, scale, dropout_p, *, key=None, training=True):
    """x1: (1,S,D)  x2: (1,S,D)  x3: (1,S,Dv)  ->  (1,S,Dv)"""
    B, S, D = x1.shape
    assert B == 1 and x2.shape == (B, S, D)
    Dv = x3.shape[-1]
    assert x3.shape == (B, S, Dv)

    q, k, v = x1[0], x2[0], x3[0]

    p = float(dropout_p)
    if training and p > 0.0 and key is not None:
        if p >= 1.0:
            mask = jnp.zeros((S, S), dtype=jnp.float32)
        else:
            keep = jax.random.bernoulli(key, 1.0 - p, (S, S))
            mask = keep.astype(jnp.float32) * (1.0 / (1.0 - p))
    else:
        # eval mode or p == 0: identity mask.
        mask = jnp.ones((S, S), dtype=jnp.float32)

    scale_arr = jnp.asarray(scale, dtype=jnp.float32).reshape(1)

    out = pl.pallas_call(
        _attn_dropout_kernel,
        out_shape=jax.ShapeDtypeStruct((S, Dv), jnp.float32),
        in_specs=[
            pl.BlockSpec(memory_space=pltpu.SMEM),                 # scale
            pl.BlockSpec(memory_space=pltpu.MemorySpace.VMEM),     # q
            pl.BlockSpec(memory_space=pltpu.MemorySpace.VMEM),     # k
            pl.BlockSpec(memory_space=pltpu.MemorySpace.VMEM),     # dropout mask
            pl.BlockSpec(memory_space=pltpu.MemorySpace.VMEM),     # v
        ],
        out_specs=pl.BlockSpec(memory_space=pltpu.MemorySpace.VMEM),
    )(scale_arr, q, k, mask, v)
    return out[None]


def _reference_no_dropout(x1, x2, x3, scale):
    s = jnp.einsum("bsd,btd->bst", x1, x2) * scale
    probs = jax.nn.softmax(s, axis=-1)
    return jnp.einsum("bst,btv->bsv", probs, x3)


if __name__ == "__main__":
    key = jax.random.PRNGKey(0)
    k1, k2, k3, kdrop = jax.random.split(key, 4)

    S, D, Dv = 128, 64, 256
    x1 = jax.random.normal(k1, (1, S, D), dtype=jnp.float32)
    x2 = jax.random.normal(k2, (1, S, D), dtype=jnp.float32)
    x3 = jax.random.normal(k3, (1, S, Dv), dtype=jnp.float32)

    # Module parameters (deterministic, per __init__).
    scale_factor = 0.5
    dropout_p = 0.1

    # Sanity check against pure-JAX reference with dropout disabled (p=0).
    out_nodrop = attention_dropout(x1, x2, x3, scale_factor, 0.0)
    jax.block_until_ready(out_nodrop)
    ref = _reference_no_dropout(x1, x2, x3, scale_factor)
    np.testing.assert_allclose(np.asarray(out_nodrop), np.asarray(ref),
                               rtol=5e-4, atol=5e-4)

    # Actual module semantics (training-mode dropout with p=0.1).
    out = attention_dropout(x1, x2, x3, scale_factor, dropout_p, key=kdrop,
                            training=True)
    jax.block_until_ready(out)
    assert out.shape == (1, S, Dv)
    assert bool(jnp.all(jnp.isfinite(out)))

    print("KERNEL_OK")
</pallas_src>

<mosaic_0001>
module attributes {stable_mosaic.version = 11 : i64} {
  func.func @_attn_dropout_kernel(%arg0: memref<1xf32, #tpu.memory_space<smem>>, %arg1: memref<128x64xf32, #tpu.memory_space<vmem>>, %arg2: memref<128x64xf32, #tpu.memory_space<vmem>>, %arg3: memref<128x128xf32, #tpu.memory_space<vmem>>, %arg4: memref<128x256xf32, #tpu.memory_space<vmem>>, %arg5: memref<128x256xf32, #tpu.memory_space<vmem>>) attributes {dimension_semantics = [], scalar_prefetch = 0 : i64, scratch_operands = 0 : i64, tpu.core_type = #tpu.core_type<tc>} {
    %c0 = arith.constant 0 : index
    %c0_0 = arith.constant 0 : index
    %0 = vector.load %arg1[%c0, %c0_0] : memref<128x64xf32, #tpu.memory_space<vmem>>, vector<128x64xf32>
    %c0_1 = arith.constant 0 : index
    %c0_2 = arith.constant 0 : index
    %1 = vector.load %arg2[%c0_1, %c0_2] : memref<128x64xf32, #tpu.memory_space<vmem>>, vector<128x64xf32>
    %cst = arith.constant dense<0.000000e+00> : vector<128x128xf32>
    %2 = tpu.matmul %0, %1, %cst {dimension_numbers = #tpu.dot_dimension_numbers<[1], [1], [0], [0], [0, 0, 1, 0], [], []>} : vector<128x64xf32>, vector<128x64xf32>, vector<128x128xf32> -> vector<128x128xf32>
    %c0_3 = arith.constant 0 : index
    %3 = memref.load %arg0[%c0_3] : memref<1xf32, #tpu.memory_space<smem>>
    %4 = vector.broadcast %3 : f32 to vector<128x128xf32>
    %5 = arith.mulf %2, %4 : vector<128x128xf32>
    %cst_4 = arith.constant dense<0xFF800000> : vector<128xf32>
    %6 = vector.multi_reduction <maximumf>, %5, %cst_4 [1] : vector<128x128xf32> to vector<128xf32>
    %7 = vector.shape_cast %6 : vector<128xf32> to vector<128x1xf32>
    %8 = vector.broadcast %7 : vector<128x1xf32> to vector<128x128xf32>
    %9 = arith.subf %5, %8 : vector<128x128xf32>
    %10 = math.exp %9 : vector<128x128xf32>
    %cst_5 = arith.constant dense<0.000000e+00> : vector<128xf32>
    %11 = vector.multi_reduction <add>, %10, %cst_5 [1] : vector<128x128xf32> to vector<128xf32>
    %12 = vector.shape_cast %11 : vector<128xf32> to vector<128x1xf32>
    %cst_6 = arith.constant 1.000000e+00 : f32
    %13 = vector.broadcast %cst_6 : f32 to vector<128x1xf32>
    %14 = arith.divf %13, %12 : vector<128x1xf32>
    %15 = vector.broadcast %14 : vector<128x1xf32> to vector<128x128xf32>
    %16 = arith.mulf %10, %15 : vector<128x128xf32>
    %c0_7 = arith.constant 0 : index
    %c0_8 = arith.constant 0 : index
    %17 = vector.load %arg3[%c0_7, %c0_8] : memref<128x128xf32, #tpu.memory_space<vmem>>, vector<128x128xf32>
    %18 = arith.mulf %16, %17 : vector<128x128xf32>
    %c0_9 = arith.constant 0 : index
    %c0_10 = arith.constant 0 : index
    %19 = vector.load %arg4[%c0_9, %c0_10] : memref<128x256xf32, #tpu.memory_space<vmem>>, vector<128x256xf32>
    %cst_11 = arith.constant dense<0.000000e+00> : vector<128x256xf32>
    %20 = tpu.matmul %18, %19, %cst_11 {dimension_numbers = #tpu.dot_dimension_numbers<[1], [0], [0], [1], [0, 0, 1, 1], [], []>} : vector<128x128xf32>, vector<128x256xf32>, vector<128x256xf32> -> vector<128x256xf32>
    %c0_12 = arith.constant 0 : index
    %c0_13 = arith.constant 0 : index
    %21 = vector.load %arg5[%c0_12, %c0_13] : memref<128x256xf32, #tpu.memory_space<vmem>>, vector<128x256xf32>
    tpu.vector_store %arg5[%c0_12, %c0_13], %20 {strides = array<i32>} : memref<128x256xf32, #tpu.memory_space<vmem>>, vector<128x256xf32>,
    return
  }
}

</mosaic_0001>

<bundles_post_ra>
// kernel: tpu_custom_call.1
= control target key start
LH: loop header
LB: loop body
LE: loop exit
PB: predicated region body
PF: predicated region fallthrough
CT: control target
= control target key end

     0   :  { %vm54_vm0 = vcmask 523264   ;;  %s1429_s0 = inlined_call_operand.<no memory space> [shape: f32[1], index: 0, kind: input, shape index: {}]   ;;  %s1430_s1 = inlined_call_operand.vmem [shape: f32[128,64], index: 1, kind: input, shape index: {}]   ;;  %s1431_s2 = inlined_call_operand.vmem [shape: f32[128,64], index: 2, kind: input, shape index: {}]   ;;  %s1432_s3 = inlined_call_operand.vmem [shape: f32[128,128], index: 3, kind: input, shape index: {}]   ;;  %s1433_s4 = inlined_call_operand.vmem [shape: f32[128,256], index: 4, kind: input, shape index: {}]   ;;  %s1434_s5 = inlined_call_operand.hbm [shape: f32[128,256], index: 5, kind: output, shape index: {}]  }
   0x1   :  { %v53_v0 = vld [vmem:[%s1431_s2 + $0x78] sm:$0xff]  ;;  %v52_v1 = vld [vmem:[%s1431_s2 + $0x70] sm:$0xff]  ;;  %v51_v2 = vld [vmem:[%s1431_s2 + $0x68] sm:$0xff] }
   0x2   :  { %811 = vmatprep.subr.msk.mxu0 %vm54_vm0, %v53_v0  ;;  %v22_v3 = vld [vmem:[%s1430_s1] sm:$0xff] }
   0x3   :  { %812 = vmatpush3.xpose.msk.msra.mxu0 %vm54_vm0, %v53_v0  ;;  %843 = vmatprep.mubr.msk.f32.mxu0 %vm54_vm0, %v22_v3  ;;  %v50_v4 = vld [vmem:[%s1431_s2 + $0x60] sm:$0xff] }
   0x4   :  { %813 = vmatprep.subr.msk.mxu0 %vm54_vm0, %v52_v1 }
   0x7   :  { %814 = vmatpush3.xpose.msk.msra.mxu0 %vm54_vm0, %v52_v1 }
   0x8   :  { %815 = vmatprep.subr.msk.mxu0 %vm54_vm0, %v51_v2 }
   0xb   :  { %816 = vmatpush3.xpose.msk.msra.mxu0 %vm54_vm0, %v51_v2 }
   0xc   :  { %11 = vsyncpa [#allocation4], 0  ;;  %817 = vmatprep.subr.msk.mxu0 %vm54_vm0, %v50_v4  ;;  %v49_v5 = vld [vmem:[%s1431_s2 + $0x58] sm:$0xff]  ;;  %v48_v6 = vld [vmem:[%s1431_s2 + $0x50] sm:$0xff]  ;;  %v297_v33 = vstv %s1429_s0 }
   0xd   :  { %v47_v7 = vld [vmem:[%s1431_s2 + $0x48] sm:$0xff]  ;;  %v46_v8 = vld [vmem:[%s1431_s2 + $0x40] sm:$0xff]  ;;  %v45_v9 = vld [vmem:[%s1431_s2 + $0x38] sm:$0xff] }
   0xe   :  { %v44_v10 = vld [vmem:[%s1431_s2 + $0x30] sm:$0xff]  ;;  %v43_v11 = vld [vmem:[%s1431_s2 + $0x28] sm:$0xff]  ;;  %v42_v12 = vld [vmem:[%s1431_s2 + $0x20] sm:$0xff] }
   0xf   :  { %818 = vmatpush3.xpose.msk.msra.mxu0 %vm54_vm0, %v50_v4  ;;  %v41_v13 = vld [vmem:[%s1431_s2 + $0x18] sm:$0xff]  ;;  %v40_v14 = vld [vmem:[%s1431_s2 + $0x10] sm:$0xff]  ;;  %v39_v15 = vld [vmem:[%s1431_s2 + $0x8] sm:$0xff] }
  0x10   :  { %819 = vmatprep.subr.msk.mxu0 %vm54_vm0, %v49_v5  ;;  %v38_v16 = vld [vmem:[%s1431_s2] sm:$0xff]  ;;  %v23_v17 = vld [vmem:[%s1430_s1 + $0x8] sm:$0xff]  ;;  %v24_v18 = vld [vmem:[%s1430_s1 + $0x10] sm:$0xff] }
  0x11   :  { %v25_v19 = vld [vmem:[%s1430_s1 + $0x18] sm:$0xff]  ;;  %v26_v20 = vld [vmem:[%s1430_s1 + $0x20] sm:$0xff]  ;;  %v27_v21 = vld [vmem:[%s1430_s1 + $0x28] sm:$0xff] }
  0x12   :  { %v28_v22 = vld [vmem:[%s1430_s1 + $0x30] sm:$0xff]  ;;  %v29_v23 = vld [vmem:[%s1430_s1 + $0x38] sm:$0xff]  ;;  %v30_v24 = vld [vmem:[%s1430_s1 + $0x40] sm:$0xff] }
  0x13   :  { %820 = vmatpush3.xpose.msk.msra.mxu0 %vm54_vm0, %v49_v5  ;;  %v31_v25 = vld [vmem:[%s1430_s1 + $0x48] sm:$0xff]  ;;  %v32_v26 = vld [vmem:[%s1430_s1 + $0x50] sm:$0xff]  ;;  %v33_v27 = vld [vmem:[%s1430_s1 + $0x58] sm:$0xff] }
  0x14   :  { %821 = vmatprep.subr.msk.mxu0 %vm54_vm0, %v48_v6  ;;  %v34_v28 = vld [vmem:[%s1430_s1 + $0x60] sm:$0xff]  ;;  %v35_v29 = vld [vmem:[%s1430_s1 + $0x68] sm:$0xff]  ;;  %v36_v30 = vld [vmem:[%s1430_s1 + $0x70] sm:$0xff] }
  0x15   :  { %v37_v31 = vld [vmem:[%s1430_s1 + $0x78] sm:$0xff]  ;;  %v536_v2 = vld [vmem:[%s1433_s4 + $0xf0] sm:$0xff]  ;;  %v535_v3 = vld [vmem:[%s1433_s4 + $0xe8] sm:$0xff] }
  0x16   :  { %v537_v1 = vld [vmem:[%s1433_s4 + $0xf8] sm:$0xff]  ;;  %v534_v4 = vld [vmem:[%s1433_s4 + $0xe0] sm:$0xff] }
  0x17   :  { %822 = vmatpush3.xpose.msk.msra.mxu0 %vm54_vm0, %v48_v6  ;;  %538 = vmatprep.subr.mxu1 %v537_v1  ;;  %v533_v5 = vld [vmem:[%s1433_s4 + $0xd8] sm:$0xff]  ;;  %v532_v6 = vld [vmem:[%s1433_s4 + $0xd0] sm:$0xff] }
  0x18   :  { %823 = vmatprep.subr.msk.mxu0 %vm54_vm0, %v47_v7  ;;  %539 = vmatpush1.msra.mxu1 %v536_v2 }
  0x19   :  { %540 = vmatprep.subr.mxu1 %v535_v3  ;;  %v522_v3 = vld [vmem:[%s1433_s4 + $0x80] sm:$0xff] }
  0x1a   :  { %541 = vmatpush1.msra.mxu1 %v534_v4  ;;  %v521_v4 = vld [vmem:[%s1433_s4 + $0x78] sm:$0xff] }
  0x1b   :  { %824 = vmatpush3.xpose.msk.msra.mxu0 %vm54_vm0, %v47_v7  ;;  %v531_v7 = vld [vmem:[%s1433_s4 + $0xc8] sm:$0xff]  ;;  %542 = vmatprep.subr.mxu1 %v533_v5 }
  0x1c   :  { %825 = vmatprep.subr.msk.mxu0 %vm54_vm0, %v46_v8  ;;  %543 = vmatpush1.msra.mxu1 %v532_v6 }
  0x1d   :  { %544 = vmatprep.subr.mxu1 %v531_v7 }
  0x1f   :  { %826 = vmatpush3.xpose.msk.msra.mxu0 %vm54_vm0, %v46_v8  ;;  %v530_v8 = vld [vmem:[%s1433_s4 + $0xc0] sm:$0xff] }
  0x20   :  { %827 = vmatprep.subr.msk.mxu0 %vm54_vm0, %v45_v9  ;;  %545 = vmatpush1.msra.mxu1 %v530_v8 }
  0x23   :  { %828 = vmatpush3.xpose.msk.msra.mxu0 %vm54_vm0, %v45_v9  ;;  %v529_v9 = vld [vmem:[%s1433_s4 + $0xb8] sm:$0xff] }
  0x24   :  { %829 = vmatprep.subr.msk.mxu0 %vm54_vm0, %v44_v10  ;;  %546 = vmatprep.subr.mxu1 %v529_v9 }
  0x27   :  { %830 = vmatpush3.xpose.msk.msra.mxu0 %vm54_vm0, %v44_v10  ;;  %v528_v10 = vld [vmem:[%s1433_s4 + $0xb0] sm:$0xff] }
  0x28   :  { %831 = vmatprep.subr.msk.mxu0 %vm54_vm0, %v43_v11  ;;  %547 = vmatpush1.msra.mxu1 %v528_v10  ;;  %v519_v10 = vld [vmem:[%s1433_s4 + $0x68] sm:$0xff] }
  0x2b   :  { %832 = vmatpush3.xpose.msk.msra.mxu0 %vm54_vm0, %v43_v11  ;;  %v527_v11 = vld [vmem:[%s1433_s4 + $0xa8] sm:$0xff] }
  0x2c   :  { %833 = vmatprep.subr.msk.mxu0 %vm54_vm0, %v42_v12  ;;  %548 = vmatprep.subr.mxu1 %v527_v11 }
  0x2f   :  { %834 = vmatpush3.xpose.msk.msra.mxu0 %vm54_vm0, %v42_v12  ;;  %v526_v12 = vld [vmem:[%s1433_s4 + $0xa0] sm:$0xff] }
  0x30   :  { %835 = vmatprep.subr.msk.mxu0 %vm54_vm0, %v41_v13  ;;  %549 = vmatpush1.msra.mxu1 %v526_v12  ;;  %v518_v12 = vld [vmem:[%s1433_s4 + $0x60] sm:$0xff] }
  0x33   :  { %836 = vmatpush3.xpose.msk.msra.mxu0 %vm54_vm0, %v41_v13  ;;  %v525_v13 = vld [vmem:[%s1433_s4 + $0x98] sm:$0xff] }
  0x34   :  { %837 = vmatprep.subr.msk.mxu0 %vm54_vm0, %v40_v14  ;;  %550 = vmatprep.subr.mxu1 %v525_v13  ;;  %v517_v13 = vld [vmem:[%s1433_s4 + $0x58] sm:$0xff] }
  0x37   :  { %838 = vmatpush3.xpose.msk.msra.mxu0 %vm54_vm0, %v40_v14  ;;  %v524_v14 = vld [vmem:[%s1433_s4 + $0x90] sm:$0xff] }
  0x38   :  { %839 = vmatprep.subr.msk.mxu0 %vm54_vm0, %v39_v15  ;;  %551 = vmatpush1.msra.mxu1 %v524_v14 }
  0x3b   :  { %840 = vmatpush3.xpose.msk.msra.mxu0 %vm54_vm0, %v39_v15 }
  0x3c   :  { %841 = vmatprep.subr.msk.mxu0 %vm54_vm0, %v38_v16 }
  0x3f   :  { %842 = vmatpush3.xpose.msk.msra.mxu0 %vm54_vm0, %v38_v16 }
  0x42   :  { %844 = vmatmul.mubr.msk.f32.vlgmr.msra.gmra.mxu0 %vm54_vm0, %v23_v17 }
  0x43   :  { %846 = vmatprep.mubr.msk.f32.mxu0 %vm54_vm0, %v24_v18 }
  0x46   :  { %847 = vmatmul.mubr.msk.f32.gmra.mxu0 %vm54_vm0, %v25_v19 }
  0x47   :  { %849 = vmatprep.mubr.msk.f32.mxu0 %vm54_vm0, %v26_v20 }
  0x4a   :  { %850 = vmatmul.mubr.msk.f32.gmra.mxu0 %vm54_vm0, %v27_v21 }
  0x4b   :  { %852 = vmatprep.mubr.msk.f32.mxu0 %vm54_vm0, %v28_v22 }
  0x4e   :  { %853 = vmatmul.mubr.msk.f32.gmra.mxu0 %vm54_vm0, %v29_v23 }
  0x4f   :  { %855 = vmatprep.mubr.msk.f32.mxu0 %vm54_vm0, %v30_v24 }
  0x52   :  { %856 = vmatmul.mubr.msk.f32.gmra.mxu0 %vm54_vm0, %v31_v25 }
  0x53   :  { %858 = vmatprep.mubr.msk.f32.mxu0 %vm54_vm0, %v32_v26 }
  0x56   :  { %859 = vmatmul.mubr.msk.f32.gmra.mxu0 %vm54_vm0, %v33_v27 }
  0x57   :  { %861 = vmatprep.mubr.msk.f32.mxu0 %vm54_vm0, %v34_v28 }
  0x5a   :  { %862 = vmatmul.mubr.msk.f32.gmra.mxu0 %vm54_vm0, %v35_v29 }
  0x5b   :  { %864 = vmatprep.mubr.msk.f32.mxu0 %vm54_vm0, %v36_v30 }
  0x5e   :  { %865 = vmatmul.mubr.msk.f32.gmra.mxu0 %vm54_vm0, %v37_v31 }
 0x102   :  { %v845_v32 = vpop.f32.mrf.mxu0 }
 0x103   :  { %v1141_v38 = vmul.f32 %v845_v32, %v297_v33 }
 0x104   :  { %v217_v34 = vpop.f32.mrf.mxu0 }
 0x105   :  { %v1138_v35 = vmul.f32 %v297_v33, %v217_v34 }
 0x106   :  { %v848_v36 = vpop.f32.mrf.mxu0 }
 0x107   :  { %314 = vmax.xlane.f32.xlu0 %v1138_v35  ;;  %v1147_v42 = vmul.f32 %v848_v36, %v297_v33 }
 0x108   :  { %v227_v37 = vpop.f32.mrf.mxu0 }
 0x109   :  { %v1143_v39 = vmul.f32 %v297_v33, %v227_v37 }
 0x10a   :  { %v851_v40 = vpop.f32.mrf.mxu0 }
 0x10b   :  { %316 = vmax.xlane.f32.xlu0 %v1141_v38  ;;  %318 = vmax.xlane.f32.xlu1 %v1143_v39  ;;  %v1151_v45 = vmul.f32 %v851_v40, %v297_v33 }
 0x10c   :  { %v237_v41 = vpop.f32.mrf.mxu0 }
 0x10d   :  { %v1149_v43 = vmul.f32 %v297_v33, %v237_v41 }
 0x10e   :  { %v854_v44 = vpop.f32.mrf.mxu0 }
 0x10f   :  { %320 = vmax.xlane.f32.xlu1 %v1147_v42  ;;  %322 = vmax.xlane.f32.xlu0 %v1149_v43  ;;  %v1157_v49 = vmul.f32 %v854_v44, %v297_v33 }
 0x110   :  { %v247_v46 = vpop.f32.mrf.mxu0 }
 0x111   :  { %v1155_v47 = vmul.f32 %v297_v33, %v247_v46 }
 0x112   :  { %v857_v48 = vpop.f32.mrf.mxu0 }
 0x113   :  { %324 = vmax.xlane.f32.xlu1 %v1151_v45  ;;  %326 = vmax.xlane.f32.xlu0 %v1155_v47  ;;  %v1163_v53 = vmul.f32 %v857_v48, %v297_v33 }
 0x114   :  { %v257_v50 = vpop.f32.mrf.mxu0 }
 0x115   :  { %v1161_v51 = vmul.f32 %v297_v33, %v257_v50 }
 0x116   :  { %v860_v52 = vpop.f32.mrf.mxu0 }
 0x117   :  { %328 = vmax.xlane.f32.xlu1 %v1157_v49  ;;  %330 = vmax.xlane.f32.xlu0 %v1161_v51  ;;  %v1169_v57 = vmul.f32 %v860_v52, %v297_v33 }
 0x118   :  { %v267_v54 = vpop.f32.mrf.mxu0 }
 0x119   :  { %v1167_v55 = vmul.f32 %v297_v33, %v267_v54 }
 0x11a   :  { %v863_v56 = vpop.f32.mrf.mxu0 }
 0x11b   :  { %332 = vmax.xlane.f32.xlu1 %v1163_v53  ;;  %334 = vmax.xlane.f32.xlu0 %v1167_v55  ;;  %v1175_v61 = vmul.f32 %v863_v56, %v297_v33 }
 0x11c   :  { %v277_v58 = vpop.f32.mrf.mxu0 }
 0x11d   :  { %v1173_v59 = vmul.f32 %v297_v33, %v277_v58 }
 0x11e   :  { %v866_v60 = vpop.f32.mrf.mxu0 }
 0x11f   :  { %336 = vmax.xlane.f32.xlu1 %v1169_v57  ;;  %338 = vmax.xlane.f32.xlu0 %v1173_v59  ;;  %v1181_v0 = vmul.f32 %v866_v60, %v297_v33 }
 0x120   :  { %v287_v62 = vpop.f32.mrf.mxu0 }
 0x121   :  { %v1179_v63 = vmul.f32 %v297_v33, %v287_v62 }
 0x123   :  { %340 = vmax.xlane.f32.xlu1 %v1175_v61  ;;  %342 = vmax.xlane.f32.xlu0 %v1179_v63 }
 0x127   :  { %344 = vmax.xlane.f32.xlu1 %v1181_v0 }
 0x190   :  { %v315_v15 = vpop.xlane.xlu0 %314 }
 0x191   :  { %v346_v16 = vsub.f32 %v1138_v35, %v315_v15 }
 0x193   :  { %v362_v17 = vmul.f32 1.442695, %v346_v16  ;;  %v515_v16 = vld [vmem:[%s1433_s4 + $0x48] sm:$0xff] }
 0x194   :  { %v317_v18 = vpop.xlane.xlu0 %316  ;;  %v319_v19 = vpop.xlane.xlu1 %318 }
 0x195   :  { %871 = vpow2.f32 %v362_v17  ;;  %v347_v20 = vsub.f32 %v1141_v38, %v317_v18  ;;  %v348_v21 = vsub.f32 %v1143_v39, %v319_v19  ;;  %v514_v18 = vld [vmem:[%s1433_s4 + $0x40] sm:$0xff]  ;;  %v513_v19 = vld [vmem:[%s1433_s4 + $0x38] sm:$0xff] }
 0x197   :  { %v364_v22 = vmul.f32 1.442695, %v347_v20  ;;  %v366_v23 = vmul.f32 1.442695, %v348_v21  ;;  %v512_v20 = vld [vmem:[%s1433_s4 + $0x30] sm:$0xff] }
 0x198   :  { %v321_v24 = vpop.xlane.xlu1 %320  ;;  %v323_v25 = vpop.xlane.xlu0 %322 }
 0x199   :  { %873 = vpow2.f32 %v364_v22  ;;  %v349_v26 = vsub.f32 %v1147_v42, %v321_v24  ;;  %v350_v27 = vsub.f32 %v1149_v43, %v323_v25  ;;  %v511_v22 = vld [vmem:[%s1433_s4 + $0x28] sm:$0xff]  ;;  %v510_v24 = vld [vmem:[%s1433_s4 + $0x20] sm:$0xff]  ;;  %v509_v25 = vld [vmem:[%s1433_s4 + $0x18] sm:$0xff] }
 0x19a   :  { %875 = vpow2.f32 %v366_v23 }
 0x19b   :  { %v368_v28 = vmul.f32 1.442695, %v349_v26  ;;  %v370_v29 = vmul.f32 1.442695, %v350_v27  ;;  %v508_v26 = vld [vmem:[%s1433_s4 + $0x10] sm:$0xff] }
 0x19c   :  { %v325_v30 = vpop.xlane.xlu1 %324  ;;  %v327_v31 = vpop.xlane.xlu0 %326 }
 0x19d   :  { %877 = vpow2.f32 %v368_v28  ;;  %v351_v32 = vsub.f32 %v1151_v45, %v325_v30  ;;  %v352_v33 = vsub.f32 %v1155_v47, %v327_v31  ;;  %v507_v28 = vld [vmem:[%s1433_s4 + $0x8] sm:$0xff]  ;;  %v506_v30 = vld [vmem:[%s1433_s4] sm:$0xff] }
 0x19e   :  { %879 = vpow2.f32 %v370_v29 }
 0x19f   :  { %v372_v34 = vmul.f32 1.442695, %v351_v32  ;;  %v374_v35 = vmul.f32 1.442695, %v352_v33  ;;  %v957_v32 = vmov 0.0  }
 0x1a0   :  { %v329_v36 = vpop.xlane.xlu1 %328  ;;  %v331_v37 = vpop.xlane.xlu0 %330  ;;  %602 = vmatprep.mubr.f32.mxu1 %v957_v32 }
 0x1a1   :  { %881 = vpow2.f32 %v372_v34  ;;  %v353_v38 = vsub.f32 %v1157_v49, %v329_v36  ;;  %v354_v39 = vsub.f32 %v1161_v51, %v331_v37 }
 0x1a2   :  { %v1237_v40 = vpop.eup %871  ;;  %883 = vpow2.f32 %v374_v35 }
 0x1a3   :  { %v376_v41 = vmul.f32 1.442695, %v353_v38  ;;  %v378_v42 = vmul.f32 1.442695, %v354_v39  ;;  %394 = vadd.xlane.f32.xlu0 %v1237_v40 }
 0x1a4   :  { %v333_v43 = vpop.xlane.xlu1 %332  ;;  %v335_v44 = vpop.xlane.xlu0 %334 }
 0x1a5   :  { %885 = vpow2.f32 %v376_v41  ;;  %v355_v45 = vsub.f32 %v1163_v53, %v333_v43  ;;  %v356_v46 = vsub.f32 %v1167_v55, %v335_v44 }
 0x1a6   :  { %v1242_v47 = vpop.eup %873  ;;  %887 = vpow2.f32 %v378_v42  ;;  %v474_v42 = vld [vmem:[%s1432_s3] sm:$0xff] }
 0x1a7   :  { %v1244_v48 = vpop.eup %875  ;;  %v380_v49 = vmul.f32 1.442695, %v355_v45  ;;  %v382_v50 = vmul.f32 1.442695, %v356_v46  ;;  %396 = vadd.xlane.f32.xlu1 %v1242_v47 }
 0x1a8   :  { %398 = vadd.xlane.f32.xlu0 %v1244_v48  ;;  %v337_v51 = vpop.xlane.xlu1 %336  ;;  %v339_v52 = vpop.xlane.xlu0 %338 }
 0x1a9   :  { %889 = vpow2.f32 %v380_v49  ;;  %v357_v54 = vsub.f32 %v1169_v57, %v337_v51  ;;  %v358_v53 = vsub.f32 %v1173_v59, %v339_v52  ;;  %v523_v59 = vld [vmem:[%s1433_s4 + $0x88] sm:$0xff] }
 0x1aa   :  { %v1250_v56 = vpop.eup %877  ;;  %891 = vpow2.f32 %v382_v50  ;;  %552 = vmatprep.subr.mxu1 %v523_v59  ;;  %v475_v49 = vld [vmem:[%s1432_s3 + $0x8] sm:$0xff] }
 0x1ab   :  { %v1252_v55 = vpop.eup %879  ;;  %v384_v58 = vmul.f32 1.442695, %v357_v54  ;;  %v386_v60 = vmul.f32 1.442695, %v358_v53  ;;  %400 = vadd.xlane.f32.xlu1 %v1250_v56  ;;  %553 = vmatpush1.msra.mxu1 %v522_v3 }
 0x1ac   :  { %402 = vadd.xlane.f32.xlu0 %v1252_v55  ;;  %v341_v62 = vpop.xlane.xlu1 %340  ;;  %v343_v1 = vpop.xlane.xlu0 %342  ;;  %554 = vmatprep.subr.mxu1 %v521_v4  ;;  %v478_v4 = vld [vmem:[%s1432_s3 + $0x20] sm:$0xff] }
 0x1ad   :  { %893 = vpow2.f32 %v384_v58  ;;  %v359_v2 = vsub.f32 %v1175_v61, %v341_v62  ;;  %v360_v57 = vsub.f32 %v1179_v63, %v343_v1  ;;  %v520_v61 = vld [vmem:[%s1433_s4 + $0x70] sm:$0xff] }
 0x1ae   :  { %v1267_v5 = vpop.eup %881  ;;  %895 = vpow2.f32 %v386_v60  ;;  %555 = vmatpush1.msra.mxu1 %v520_v61  ;;  %v476_v58 = vld [vmem:[%s1432_s3 + $0x10] sm:$0xff] }
 0x1af   :  { %v1272_v63 = vpop.eup %883  ;;  %v388_v6 = vmul.f32 1.442695, %v359_v2  ;;  %v390_v7 = vmul.f32 1.442695, %v360_v57  ;;  %404 = vadd.xlane.f32.xlu1 %v1267_v5  ;;  %556 = vmatprep.subr.mxu1 %v519_v10  ;;  %v477_v2 = vld [vmem:[%s1432_s3 + $0x18] sm:$0xff] }
 0x1b0   :  { %406 = vadd.xlane.f32.xlu0 %v1272_v63  ;;  %v345_v8 = vpop.xlane.xlu1 %344  ;;  %557 = vmatpush1.msra.mxu1 %v518_v12 }
 0x1b1   :  { %897 = vpow2.f32 %v388_v6  ;;  %v361_v9 = vsub.f32 %v1181_v0, %v345_v8  ;;  %v516_v0 = vld [vmem:[%s1433_s4 + $0x50] sm:$0xff]  ;;  %558 = vmatprep.subr.mxu1 %v517_v13  ;;  %v479_v8 = vld [vmem:[%s1432_s3 + $0x28] sm:$0xff] }
 0x1b2   :  { %v1280_v11 = vpop.eup %885  ;;  %899 = vpow2.f32 %v390_v7  ;;  %559 = vmatpush1.msra.mxu1 %v516_v0  ;;  %v480_v13 = vld [vmem:[%s1432_s3 + $0x30] sm:$0xff] }
 0x1b3   :  { %v1291_v14 = vpop.eup %887  ;;  %v392_v15 = vmul.f32 1.442695, %v361_v9  ;;  %408 = vadd.xlane.f32.xlu1 %v1280_v11  ;;  %560 = vmatprep.subr.mxu1 %v515_v16 }
 0x1b4   :  { %410 = vadd.xlane.f32.xlu0 %v1291_v14  ;;  %561 = vmatpush1.msra.mxu1 %v514_v18  ;;  %v481_v18 = vld [vmem:[%s1432_s3 + $0x38] sm:$0xff] }
 0x1b5   :  { %901 = vpow2.f32 %v392_v15  ;;  %562 = vmatprep.subr.mxu1 %v513_v19 }
 0x1b6   :  { %v1298_v17 = vpop.eup %889  ;;  %563 = vmatpush1.msra.mxu1 %v512_v20 }
 0x1b7   :  { %v1309_v21 = vpop.eup %891  ;;  %412 = vadd.xlane.f32.xlu1 %v1298_v17  ;;  %564 = vmatprep.subr.mxu1 %v511_v22 }
 0x1b8   :  { %414 = vadd.xlane.f32.xlu0 %v1309_v21  ;;  %565 = vmatpush1.msra.mxu1 %v510_v24  ;;  %v482_v24 = vld [vmem:[%s1432_s3 + $0x40] sm:$0xff] }
 0x1b9   :  { %566 = vmatprep.subr.mxu1 %v509_v25 }
 0x1ba   :  { %v1316_v23 = vpop.eup %893  ;;  %567 = vmatpush1.msra.mxu1 %v508_v26 }
 0x1bb   :  { %v1327_v27 = vpop.eup %895  ;;  %416 = vadd.xlane.f32.xlu1 %v1316_v23  ;;  %568 = vmatprep.subr.mxu1 %v507_v28 }
 0x1bc   :  { %418 = vadd.xlane.f32.xlu0 %v1327_v27  ;;  %569 = vmatpush1.msra.mxu1 %v506_v30  ;;  %v483_v30 = vld [vmem:[%s1432_s3 + $0x48] sm:$0xff] }
 0x1be   :  { %v1334_v29 = vpop.eup %897 }
 0x1bf   :  { %v1339_v31 = vpop.eup %899  ;;  %420 = vadd.xlane.f32.xlu1 %v1334_v29 }
 0x1c0   :  { %422 = vadd.xlane.f32.xlu0 %v1339_v31 }
 0x1c2   :  { %v1344_v33 = vpop.eup %901 }
 0x1c3   :  { %424 = vadd.xlane.f32.xlu1 %v1344_v33 }
 0x22c   :  { %v395_v34 = vpop.xlane.xlu0 %394 }
 0x22d   :  { %903 = vrcp.f32 %v395_v34 }
 0x230   :  { %v397_v35 = vpop.xlane.xlu1 %396 }
 0x231   :  { %905 = vrcp.f32 %v397_v35  ;;  %v399_v36 = vpop.xlane.xlu0 %398 }
 0x232   :  { %907 = vrcp.f32 %v399_v36 }
 0x234   :  { %v401_v37 = vpop.xlane.xlu1 %400 }
 0x235   :  { %909 = vrcp.f32 %v401_v37  ;;  %v403_v38 = vpop.xlane.xlu0 %402  ;;  %v484_v37 = vld [vmem:[%s1432_s3 + $0x50] sm:$0xff] }
 0x236   :  { %911 = vrcp.f32 %v403_v38 }
 0x238   :  { %v405_v41 = vpop.xlane.xlu1 %404 }
 0x239   :  { %913 = vrcp.f32 %v405_v41  ;;  %v407_v46 = vpop.xlane.xlu0 %406  ;;  %v485_v41 = vld [vmem:[%s1432_s3 + $0x58] sm:$0xff] }
 0x23a   :  { %v904_v39 = vpop.eup %903  ;;  %915 = vrcp.f32 %v407_v46 }
 0x23b   :  { %v458_v43 = vmul.f32 %v904_v39, %v1237_v40 }
 0x23c   :  { %v409_v40 = vpop.xlane.xlu1 %408 }
 0x23d   :  { %v490_v44 = vmul.f32 %v474_v42, %v458_v43  ;;  %917 = vrcp.f32 %v409_v40  ;;  %v411_v1 = vpop.xlane.xlu0 %410 }
 0x23e   :  { %v906_v45 = vpop.eup %905  ;;  %919 = vrcp.f32 %v411_v1 }
 0x23f   :  { %v908_v50 = vpop.eup %907  ;;  %603 = vmatmul.mubr.f32.vlgmr.msra.gmra.mxu1 %v490_v44  ;;  %v459_v51 = vmul.f32 %v906_v45, %v1242_v47  ;;  %v486_v44 = vld [vmem:[%s1432_s3 + $0x60] sm:$0xff] }
 0x240   :  { %608 = vmatprep.mubr.f32.mxu1 %v957_v32  ;;  %v460_v54 = vmul.f32 %v908_v50, %v1244_v48  ;;  %v413_v3 = vpop.xlane.xlu1 %412 }
 0x241   :  { %v491_v52 = vmul.f32 %v475_v49, %v459_v51  ;;  %921 = vrcp.f32 %v413_v3  ;;  %v415_v7 = vpop.xlane.xlu0 %414  ;;  %v487_v49 = vld [vmem:[%s1432_s3 + $0x68] sm:$0xff] }
 0x242   :  { %v910_v53 = vpop.eup %909  ;;  %v492_v60 = vmul.f32 %v476_v58, %v460_v54  ;;  %923 = vrcp.f32 %v415_v7 }
 0x243   :  { %609 = vmatmul.mubr.f32.gmra.mxu1 %v491_v52  ;;  %v461_v62 = vmul.f32 %v910_v53, %v1250_v56  ;;  %v912_v47 = vpop.eup %911  ;;  %v488_v52 = vld [vmem:[%s1432_s3 + $0x70] sm:$0xff]  ;;  %v489_v53 = vld [vmem:[%s1432_s3 + $0x78] sm:$0xff]  ;;  %s958_s3 = smov [#allocation3]  }
 0x244   :  { %614 = vmatprep.mubr.f32.mxu1 %v957_v32  ;;  %v462_v57 = vmul.f32 %v912_v47, %v1252_v55  ;;  %v417_v12 = vpop.xlane.xlu1 %416  ;;  %s736_s15 = sshll.u32 %s958_s3, 4  ;;  %s737_s15 = int_to_ptr.vmem [resolvable:$true] %s736_s15 }
 0x245   :  { %v493_v48 = vmul.f32 %v477_v2, %v461_v62  ;;  %925 = vrcp.f32 %v417_v12  ;;  %v419_v16 = vpop.xlane.xlu0 %418  ;;  %s935_s16 = scalar_lea.vmem %s737_s15, 4096  ;;  %p940_p1 = scmp.lt.s32.totalorder %s737_s15, %s737_s15 }
 0x246   :  { %v914_v59 = vpop.eup %913  ;;  %v494_v56 = vmul.f32 %v478_v4, %v462_v57  ;;  %927 = vrcp.f32 %v419_v16  ;;  %p936_p0 = scmp.ne.s32.totalorder %s737_s15, %s935_s16  ;;  %p941_p2 = scmp.lt.s32.totalorder %s935_s16, %s935_s16 }
 0x247   :  { %615 = vmatmul.mubr.f32.gmra.mxu1 %v492_v60  ;;  %v463_v61 = vmul.f32 %v914_v59, %v1267_v5  ;;  %v916_v6 = vpop.eup %915 }
 0x248   :  { %620 = vmatprep.mubr.f32.mxu1 %v957_v32  ;;  %v464_v9 = vmul.f32 %v916_v6, %v1272_v63  ;;  %v421_v22 = vpop.xlane.xlu1 %420  ;;  %p942_p3 = por %p941_p2, %p940_p1 }
 0x249   :  { %v495_v55 = vmul.f32 %v479_v8, %v463_v61  ;;  %929 = vrcp.f32 %v421_v22  ;;  %v423_v28 = vpop.xlane.xlu0 %422 }
 0x24a   :  { %v918_v10 = vpop.eup %917  ;;  %v496_v5 = vmul.f32 %v480_v13, %v464_v9  ;;  %931 = vrcp.f32 %v423_v28  ;;  %p943_p4 = pnand %p942_p3, %p936_p0 }
 0x24b   :  { %621 = vmatmul.mubr.f32.gmra.mxu1 %v493_v48  ;;  %v465_v0 = vmul.f32 %v918_v10, %v1280_v11  ;;  %v920_v15 = vpop.eup %919 }
 0x24c   :  { %626 = vmatprep.mubr.f32.mxu1 %v957_v32  ;;  %v466_v19 = vmul.f32 %v920_v15, %v1291_v14  ;;  %v425_v36 = vpop.xlane.xlu1 %424 }
 0x24d   :  { %v497_v63 = vmul.f32 %v481_v18, %v465_v0  ;;  %933 = vrcp.f32 %v425_v36 }
 0x24e   :  { %v922_v20 = vpop.eup %921  ;;  %v498_v11 = vmul.f32 %v482_v24, %v466_v19 }
 0x24f   :  { %627 = vmatmul.mubr.f32.gmra.mxu1 %v494_v56  ;;  %v467_v25 = vmul.f32 %v922_v20, %v1298_v17  ;;  %v924_v26 = vpop.eup %923 }
 0x250   :  { %632 = vmatprep.mubr.f32.mxu1 %v957_v32  ;;  %v468_v34 = vmul.f32 %v924_v26, %v1309_v21 }
 0x251   :  { %v499_v14 = vmul.f32 %v483_v30, %v467_v25 }
 0x252   :  { %v926_v35 = vpop.eup %925  ;;  %v500_v17 = vmul.f32 %v484_v37, %v468_v34 }
 0x253   :  { %633 = vmatmul.mubr.f32.gmra.mxu1 %v495_v55  ;;  %v469_v38 = vmul.f32 %v926_v35, %v1316_v23  ;;  %v928_v39 = vpop.eup %927 }
 0x254   :  { %638 = vmatprep.mubr.f32.mxu1 %v957_v32  ;;  %v470_v42 = vmul.f32 %v928_v39, %v1327_v27 }
 0x255   :  { %v501_v21 = vmul.f32 %v485_v41, %v469_v38 }
 0x256   :  { %v930_v43 = vpop.eup %929  ;;  %v502_v23 = vmul.f32 %v486_v44, %v470_v42 }
 0x257   :  { %639 = vmatmul.mubr.f32.gmra.mxu1 %v496_v5  ;;  %v471_v45 = vmul.f32 %v930_v43, %v1334_v29  ;;  %v932_v46 = vpop.eup %931 }
 0x258   :  { %644 = vmatprep.mubr.f32.mxu1 %v957_v32  ;;  %v472_v50 = vmul.f32 %v932_v46, %v1339_v31 }
 0x259   :  { %v503_v27 = vmul.f32 %v487_v49, %v471_v45 }
 0x25a   :  { %v934_v51 = vpop.eup %933  ;;  %v504_v29 = vmul.f32 %v488_v52, %v472_v50 }
 0x25b   :  { %645 = vmatmul.mubr.f32.gmra.mxu1 %v497_v63  ;;  %v473_v54 = vmul.f32 %v934_v51, %v1344_v33 }
 0x25c   :  { %650 = vmatprep.mubr.f32.mxu1 %v957_v32 }
 0x25d   :  { %v505_v40 = vmul.f32 %v489_v53, %v473_v54 }
 0x25f   :  { %651 = vmatmul.mubr.f32.gmra.mxu1 %v498_v11 }
 0x260   :  { %656 = vmatprep.mubr.f32.mxu1 %v957_v32 }
 0x263   :  { %657 = vmatmul.mubr.f32.gmra.mxu1 %v499_v14 }
 0x264   :  { %662 = vmatprep.mubr.f32.mxu1 %v957_v32 }
 0x267   :  { %663 = vmatmul.mubr.f32.gmra.mxu1 %v500_v17 }
 0x268   :  { %668 = vmatprep.mubr.f32.mxu1 %v957_v32 }
 0x26b   :  { %669 = vmatmul.mubr.f32.gmra.mxu1 %v501_v21 }
 0x26c   :  { %674 = vmatprep.mubr.f32.mxu1 %v957_v32 }
 0x26f   :  { %675 = vmatmul.mubr.f32.gmra.mxu1 %v502_v23 }
 0x270   :  { %680 = vmatprep.mubr.f32.mxu1 %v957_v32 }
 0x273   :  { %681 = vmatmul.mubr.f32.gmra.mxu1 %v503_v27 }
 0x274   :  { %686 = vmatprep.mubr.f32.mxu1 %v957_v32 }
 0x277   :  { %687 = vmatmul.mubr.f32.gmra.mxu1 %v504_v29 }
 0x278   :  { %692 = vmatprep.mubr.f32.mxu1 %v957_v32 }
 0x27b   :  { %693 = vmatmul.mubr.f32.gmra.mxu1 %v505_v40 }
 0x2ff   :  { %v604_v31 = vpop.f32.mrf.mxu1 }
 0x300   :  { %699 = vst [vmem:[#allocation3] sm:$0xff] %v604_v31 }
 0x301   :  { %v606_v58 = vpop.f32.mrf.mxu1 }
 0x302   :  { %700 = vst [vmem:[#allocation3 + $0x8] sm:$0xff] %v606_v58 }
 0x303   :  { %v610_v60 = vpop.f32.mrf.mxu1 }
 0x304   :  { %701 = vst [vmem:[#allocation3 + $0x10] sm:$0xff] %v610_v60 }
 0x305   :  { %v612_v62 = vpop.f32.mrf.mxu1 }
 0x306   :  { %702 = vst [vmem:[#allocation3 + $0x18] sm:$0xff] %v612_v62 }
 0x307   :  { %v616_v47 = vpop.f32.mrf.mxu1 }
 0x308   :  { %703 = vst [vmem:[#allocation3 + $0x20] sm:$0xff] %v616_v47 }
 0x309   :  { %v618_v33 = vpop.f32.mrf.mxu1 }
 0x30a   :  { %704 = vst [vmem:[#allocation3 + $0x28] sm:$0xff] %v618_v33 }
 0x30b   :  { %v622_v1 = vpop.f32.mrf.mxu1 }
 0x30c   :  { %705 = vst [vmem:[#allocation3 + $0x30] sm:$0xff] %v622_v1 }
 0x30d   :  { %v624_v2 = vpop.f32.mrf.mxu1 }
 0x30e   :  { %706 = vst [vmem:[#allocation3 + $0x38] sm:$0xff] %v624_v2 }
 0x30f   :  { %v628_v48 = vpop.f32.mrf.mxu1 }
 0x310   :  { %707 = vst [vmem:[#allocation3 + $0x40] sm:$0xff] %v628_v48 }
 0x311   :  { %v630_v32 = vpop.f32.mrf.mxu1 }
 0x312   :  { %708 = vst [vmem:[#allocation3 + $0x48] sm:$0xff] %v630_v32 }
 0x313   :  { %v634_v57 = vpop.f32.mrf.mxu1 }
 0x314   :  { %709 = vst [vmem:[#allocation3 + $0x50] sm:$0xff] %v634_v57 }
 0x315   :  { %v636_v59 = vpop.f32.mrf.mxu1 }
 0x316   :  { %710 = vst [vmem:[#allocation3 + $0x58] sm:$0xff] %v636_v59 }
 0x317   :  { %v640_v3 = vpop.f32.mrf.mxu1 }
 0x318   :  { %711 = vst [vmem:[#allocation3 + $0x60] sm:$0xff] %v640_v3 }
 0x319   :  { %v642_v4 = vpop.f32.mrf.mxu1 }
 0x31a   :  { %712 = vst [vmem:[#allocation3 + $0x68] sm:$0xff] %v642_v4 }
 0x31b   :  { %v646_v56 = vpop.f32.mrf.mxu1 }
 0x31c   :  { %713 = vst [vmem:[#allocation3 + $0x70] sm:$0xff] %v646_v56 }
 0x31d   :  { %v648_v61 = vpop.f32.mrf.mxu1 }
 0x31e   :  { %714 = vst [vmem:[#allocation3 + $0x78] sm:$0xff] %v648_v61 }
 0x31f   :  { %v652_v6 = vpop.f32.mrf.mxu1 }
 0x320   :  { %715 = vst [vmem:[#allocation3 + $0x80] sm:$0xff] %v652_v6 }
 0x321   :  { %v654_v7 = vpop.f32.mrf.mxu1 }
 0x322   :  { %716 = vst [vmem:[#allocation3 + $0x88] sm:$0xff] %v654_v7 }
 0x323   :  { %v658_v8 = vpop.f32.mrf.mxu1 }
 0x324   :  { %717 = vst [vmem:[#allocation3 + $0x90] sm:$0xff] %v658_v8 }
 0x325   :  { %v660_v55 = vpop.f32.mrf.mxu1 }
 0x326   :  { %718 = vst [vmem:[#allocation3 + $0x98] sm:$0xff] %v660_v55 }
 0x327   :  { %v664_v9 = vpop.f32.mrf.mxu1 }
 0x328   :  { %719 = vst [vmem:[#allocation3 + $0xa0] sm:$0xff] %v664_v9 }
 0x329   :  { %v666_v10 = vpop.f32.mrf.mxu1 }
 0x32a   :  { %720 = vst [vmem:[#allocation3 + $0xa8] sm:$0xff] %v666_v10 }
 0x32b   :  { %v670_v12 = vpop.f32.mrf.mxu1 }
 0x32c   :  { %721 = vst [vmem:[#allocation3 + $0xb0] sm:$0xff] %v670_v12 }
 0x32d   :  { %v672_v13 = vpop.f32.mrf.mxu1 }
 0x32e   :  { %722 = vst [vmem:[#allocation3 + $0xb8] sm:$0xff] %v672_v13 }
 0x32f   :  { %v676_v5 = vpop.f32.mrf.mxu1 }
 0x330   :  { %723 = vst [vmem:[#allocation3 + $0xc0] sm:$0xff] %v676_v5 }
 0x331   :  { %v678_v0 = vpop.f32.mrf.mxu1 }
 0x332   :  { %724 = vst [vmem:[#allocation3 + $0xc8] sm:$0xff] %v678_v0 }
 0x333   :  { %v682_v15 = vpop.f32.mrf.mxu1 }
 0x334   :  { %725 = vst [vmem:[#allocation3 + $0xd0] sm:$0xff] %v682_v15 }
 0x335   :  { %v684_v16 = vpop.f32.mrf.mxu1 }
 0x336   :  { %726 = vst [vmem:[#allocation3 + $0xd8] sm:$0xff] %v684_v16 }
 0x337   :  { %v688_v18 = vpop.f32.mrf.mxu1 }
 0x338   :  { %727 = vst [vmem:[#allocation3 + $0xe0] sm:$0xff] %v688_v18 }
 0x339   :  { %v690_v63 = vpop.f32.mrf.mxu1 }
 0x33a   :  { %728 = vst [vmem:[#allocation3 + $0xe8] sm:$0xff] %v690_v63 }
 0x33b   :  { %v694_v19 = vpop.f32.mrf.mxu1 }
 0x33c   :  { %729 = vst [vmem:[#allocation3 + $0xf0] sm:$0xff] %v694_v19 }
 0x33d   :  { %v696_v20 = vpop.f32.mrf.mxu1 }
 0x33e   :  { %730 = vst [vmem:[#allocation3 + $0xf8] sm:$0xff] %v696_v20 }
 0x33f   :  { %946 = shalt.err (!%p943_p4)
}
 0x340   :  { %s959_s17 = smov 256   ;;  %s960_s18 = smov 16  }
 0x341   :  { %742 = dma.vmem_to_hbm [thread:$0]  %s737_s15, 4096, %s1434_s5, [#allocation4], %s959_s17, %s959_s17, %s960_s18  }
 0x342   :  { %955 = dma.done.wait [#allocation4], 4096  }
 0x343   :  { %956 = vsyncadd [#allocation4], 4294963200 }
 0x344   :  { %746 = vsyncpa [#allocation4], 1 }

</bundles_post_ra>
